<compile_context>
chip_gen: v7x
topology: tpu7x:2x2x1
jax: 0.10.0
libtpu: 0.0.40
codegen_flags: <defaults>
</compile_context>

<pallas_src>
import numpy as np
import jax
import jax.numpy as jnp
from jax.experimental import pallas as pl
from jax.experimental.pallas import tpu as pltpu

LANE = 128
EPS = 1e-4
_MiB = 1024 * 1024


def _sublane_packing(dtype):
    """Native second-minor packing: 8 rows (4-byte), 16 (2-byte), 32 (1-byte)."""
    return max(8, 32 // jnp.dtype(dtype).itemsize)


def _vmem_budget_and_limit():
    """(double-buffered working-set budget, vmem_limit_bytes or None) per chip gen."""
    kind = ""
    try:
        kind = jax.devices()[0].device_kind.lower()
    except Exception:
        pass
    cap = None
    try:
        cap = int(pltpu.get_tpu_info().vmem_capacity_bytes)
    except Exception:
        pass
    if "v5" in kind:
        # v5e: 16 MiB scoped-VMEM default, 0.82 TB/s HBM -- bigger tiles buy
        # little; stay inside the default (no vmem_limit override needed).
        return 12 * _MiB, None
    if cap is not None and cap <= 80 * _MiB:
        # v7x: only 64 MiB physical VMEM -> ~28 MiB working set, 48 MiB limit.
        return 28 * _MiB, 48 * _MiB
    if cap is not None:
        # v6e / other 128 MiB-VMEM chips: ~28 MiB working set, raise the
        # 32 MiB scoped default explicitly.
        return 28 * _MiB, min(64 * _MiB, cap // 2)
    # Unknown chip: conservative budget that fits every scoped-VMEM default.
    return 12 * _MiB, None


def _make_bifpn_kernel(L):
    """o = sum_i wn[i] * x_i ; wn already normalized (scalar-prefetched to SMEM)."""

    def kernel(wn_ref, *refs):
        x_refs = refs[:L]
        o_ref = refs[L]
        acc = x_refs[0][...].astype(jnp.float32) * wn_ref[0]
        for i in range(1, L):            # L is small & static -> unrolled
            acc = acc + x_refs[i][...].astype(jnp.float32) * wn_ref[i]
        o_ref[...] = acc.astype(o_ref.dtype)

    return kernel


def _fuse_aligned(xs, wn, dtype, R, L, max_rows_per_tile):
    """Run the Pallas kernel over L lane-aligned (R, 128) slabs."""
    itemsize = jnp.dtype(dtype).itemsize
    packing = _sublane_packing(dtype)
    budget, vmem_limit = _vmem_budget_and_limit()

    # Per row of a block: (L inputs + 1 output), each double-buffered by Pallas.
    bytes_per_row = LANE * itemsize * 2 * (L + 1)
    vmem_cap_rows = max(packing, budget // bytes_per_row)

    row_tile = min(max(max_rows_per_tile, packing), vmem_cap_rows, R)
    # >= 2 grid steps whenever possible so both v7x TensorCores pull from HBM.
    if R >= 2 * packing:
        row_tile = min(row_tile, -(-R // 2))
    if row_tile < R:
        row_tile = (row_tile // packing) * packing   # native packed-tile alignment
    num_tiles = -(-R // row_tile)                    # partial last block is masked

    x_spec = pl.BlockSpec((row_tile, LANE), lambda i, wn_s: (i, 0))
    out_spec = pl.BlockSpec((row_tile, LANE), lambda i, wn_s: (i, 0))

    cp = dict(dimension_semantics=("parallel",))
    if vmem_limit is not None:
        cp["vmem_limit_bytes"] = int(vmem_limit)

    return pl.pallas_call(
        _make_bifpn_kernel(L),
        out_shape=jax.ShapeDtypeStruct((R, LANE), dtype),
        grid_spec=pltpu.PrefetchScalarGridSpec(
            num_scalar_prefetch=1,                   # wn -> SMEM before step 0
            grid=(num_tiles,),
            in_specs=[x_spec] * L,
            out_specs=out_spec,
        ),
        compiler_params=pltpu.CompilerParams(**cp),
    )(wn, *xs)


def bi_fpn(x_list, weight, *, max_rows_per_tile=8192):
    """Fuses a list of same-shape feature maps with learned BiFPN weights."""
    L = len(x_list)
    assert L >= 1
    shape = x_list[0].shape
    dtype = x_list[0].dtype
    for x in x_list:
        assert x.shape == shape and x.dtype == dtype, "all inputs must share shape/dtype"
    M = int(np.prod(shape))

    # --- weight normalization: once, O(L) scalar work -------------------------
    w = weight.astype(jnp.float32)
    wn = w / (jnp.sum(w * jax.nn.sigmoid(w)) + EPS)           # (L,)

    M_main = (M // LANE) * LANE
    R = M_main // LANE

    if M_main == 0:
        # Degenerate (< 128 elements total): not worth a kernel launch.
        xs = jnp.stack([x.reshape(M) for x in x_list], 0).astype(jnp.float32)
        return jnp.sum(wn[:, None] * xs, axis=0).astype(dtype).reshape(shape)

    flats = [x.reshape(M) for x in x_list]                    # free for contiguous
    if M_main == M:
        mains = [f.reshape(R, LANE) for f in flats]           # zero-copy path
    else:
        # Lane-aligned prefix through the kernel; tiny ragged tail handled below.
        mains = [f[:M_main].reshape(R, LANE) for f in flats]

    out_main = _fuse_aligned(mains, wn, dtype, R, L, max_rows_per_tile)  # (R, 128)
    out_flat = out_main.reshape(M_main)

    if M_main != M:
        tails = jnp.stack([f[M_main:] for f in flats], 0).astype(jnp.float32)
        tail = jnp.sum(wn[:, None] * tails, axis=0).astype(dtype)        # < 128 elems
        out_flat = jnp.concatenate([out_flat, tail])
    return out_flat.reshape(shape)


def bi_fpn_reference(x_list, weight):
    w = weight.astype(jnp.float32)
    wn = w / (jnp.sum(w * jax.nn.sigmoid(w)) + EPS)
    xs = jnp.stack([x.astype(jnp.float32) for x in x_list], axis=0)
    wn = wn.reshape((-1,) + (1,) * (xs.ndim - 1))
    return jnp.sum(wn * xs, axis=0).astype(x_list[0].dtype)


if __name__ == "__main__":
    # Bi_FPN(length=3) fusing 3 feature maps of shape (2, 4, 16, 16), NCHW.
    length = 3
    N, C, H, W = 2, 4, 16, 16

    key = jax.random.PRNGKey(0)
    keys = jax.random.split(key, length)
    x_list = [jax.random.normal(k, (N, C, H, W), dtype=jnp.float32) for k in keys]

    # deterministic parameter init, matching nn.Parameter(torch.ones(length))
    weight = jnp.ones((length,), dtype=jnp.float32)

    out = jax.block_until_ready(bi_fpn(x_list, weight))
    ref = bi_fpn_reference(x_list, weight)

    assert out.shape == (N, C, H, W)
    assert out.dtype == x_list[0].dtype
    assert jnp.allclose(out, ref, atol=1e-5, rtol=1e-5), "mismatch vs reference"

    print("KERNEL_OK")
</pallas_src>

<mosaic_0001>
module attributes {stable_mosaic.version = 11 : i64} {
  func.func @kernel(%arg0: i32, %arg1: memref<3xf32, #tpu.memory_space<smem>>, %arg2: memref<8x128xf32, #tpu.memory_space<vmem>>, %arg3: memref<8x128xf32, #tpu.memory_space<vmem>>, %arg4: memref<8x128xf32, #tpu.memory_space<vmem>>, %arg5: memref<8x128xf32, #tpu.memory_space<vmem>>) attributes {dimension_semantics = [#tpu.dimension_semantics<parallel>], iteration_bounds = array<i64: 2>, scalar_prefetch = 1 : i64, scratch_operands = 0 : i64, tpu.core_type = #tpu.core_type<tc>, window_params = [{transform_indices = @transform_0, window_bounds = array<i64: 8, 128>}, {transform_indices = @transform_1, window_bounds = array<i64: 8, 128>}, {transform_indices = @transform_2, window_bounds = array<i64: 8, 128>}, {transform_indices = @transform_3, window_bounds = array<i64: 8, 128>}]} {
    %c0 = arith.constant 0 : index
    %c0_0 = arith.constant 0 : index
    %0 = vector.load %arg2[%c0, %c0_0] : memref<8x128xf32, #tpu.memory_space<vmem>>, vector<8x128xf32>
    %c0_1 = arith.constant 0 : index
    %1 = memref.load %arg1[%c0_1] : memref<3xf32, #tpu.memory_space<smem>>
    %2 = vector.broadcast %1 : f32 to vector<8x128xf32>
    %3 = arith.mulf %0, %2 : vector<8x128xf32>
    %c0_2 = arith.constant 0 : index
    %c0_3 = arith.constant 0 : index
    %4 = vector.load %arg3[%c0_2, %c0_3] : memref<8x128xf32, #tpu.memory_space<vmem>>, vector<8x128xf32>
    %c1 = arith.constant 1 : index
    %5 = memref.load %arg1[%c1] : memref<3xf32, #tpu.memory_space<smem>>
    %6 = vector.broadcast %5 : f32 to vector<8x128xf32>
    %7 = arith.mulf %4, %6 : vector<8x128xf32>
    %8 = arith.addf %3, %7 : vector<8x128xf32>
    %c0_4 = arith.constant 0 : index
    %c0_5 = arith.constant 0 : index
    %9 = vector.load %arg4[%c0_4, %c0_5] : memref<8x128xf32, #tpu.memory_space<vmem>>, vector<8x128xf32>
    %c2 = arith.constant 2 : index
    %10 = memref.load %arg1[%c2] : memref<3xf32, #tpu.memory_space<smem>>
    %11 = vector.broadcast %10 : f32 to vector<8x128xf32>
    %12 = arith.mulf %9, %11 : vector<8x128xf32>
    %13 = arith.addf %8, %12 : vector<8x128xf32>
    %c0_6 = arith.constant 0 : index
    %c0_7 = arith.constant 0 : index
    %14 = vector.load %arg5[%c0_6, %c0_7] : memref<8x128xf32, #tpu.memory_space<vmem>>, vector<8x128xf32>
    tpu.vector_store %arg5[%c0_6, %c0_7], %13 {strides = array<i32>} : memref<8x128xf32, #tpu.memory_space<vmem>>, vector<8x128xf32>,
    return
  }
  func.func @transform_0(%arg0: i32, %arg1: memref<3xf32, #tpu.memory_space<smem>>) -> (i32, i32) {
    %c0_i32 = arith.constant 0 : i32
    %c0_i32_0 = arith.constant 0 : i32
    return %arg0, %c0_i32 : i32, i32
  }
  func.func @transform_1(%arg0: i32, %arg1: memref<3xf32, #tpu.memory_space<smem>>) -> (i32, i32) {
    %c0_i32 = arith.constant 0 : i32
    %c0_i32_0 = arith.constant 0 : i32
    return %arg0, %c0_i32 : i32, i32
  }
  func.func @transform_2(%arg0: i32, %arg1: memref<3xf32, #tpu.memory_space<smem>>) -> (i32, i32) {
    %c0_i32 = arith.constant 0 : i32
    %c0_i32_0 = arith.constant 0 : i32
    return %arg0, %c0_i32 : i32, i32
  }
  func.func @transform_3(%arg0: i32, %arg1: memref<3xf32, #tpu.memory_space<smem>>) -> (i32, i32) {
    %c0_i32 = arith.constant 0 : i32
    %c0_i32_0 = arith.constant 0 : i32
    return %arg0, %c0_i32 : i32, i32
  }
}

</mosaic_0001>

<bundles_post_ra>
// kernel: tpu_custom_call.1
= control target key start
LH: loop header
LB: loop body
LE: loop exit
PB: predicated region body
PF: predicated region fallthrough
CT: control target
= control target key end

     0   :  { %s932_s0 = inlined_call_operand.hbm [shape: f32[3], index: 0, kind: input, shape index: {}]   ;;  %s933_s1 = inlined_call_operand.hbm [shape: f32[16,128], index: 1, kind: input, shape index: {}]   ;;  %s934_s2 = inlined_call_operand.hbm [shape: f32[16,128], index: 2, kind: input, shape index: {}]   ;;  %s935_s3 = inlined_call_operand.hbm [shape: f32[16,128], index: 3, kind: input, shape index: {}]   ;;  %s936_s4 = inlined_call_operand.hbm [shape: f32[16,128], index: 4, kind: output, shape index: {}]  }
   0x1   :  { %941 = sst [smem:[#allocation15_spill]] %s934_s2  ;;  %s481_s17 = scalar_lea.hbm %s932_s0, 16 }
   0x2   :  { %p482_p0 = scmp.ne.s32.totalorder %s932_s0, %s481_s17  ;;  %p485_p1 = scmp.lt.u32.totalorder %s481_s17, %s932_s0 }
   0x4   :  { %p487_p2 = pnand %p485_p1, %p482_p0 }
   0x6   :  { %490 = shalt.err (!%p487_p2)  }
   0x7   :  { %s655_s22 = smov [#allocation3]  }
   0x8   :  { %10 = dma.hbm_to_smem %s932_s0, 16, %s655_s22, [#allocation2] }
   0x9   :  { %625 = dma.done.wait [#allocation2], 16 }
   0xa   :  { %626 = vsyncadd [#allocation2], 4294967280 }
   0xb   :  { %12 = sfence }
   0xc   :  { %13 = vsyncpa [#allocation5], 0 }
   0xd   :  { %15 = vsyncpa [#allocation5 + $0x1], 0 }
   0xe   :  { %16 = vsyncpa [#allocation8], 0 }
   0xf   :  { %18 = vsyncpa [#allocation8 + $0x1], 0 }
  0x10   :  { %19 = vsyncpa [#allocation6], 0 }
  0x11   :  { %21 = vsyncpa [#allocation6 + $0x1], 0  ;;  %s697_s25 = smov 0   ;;  %s699_s26 = smov 0  }
  0x12   :  { %s701_s27 = smov 0   ;;  %s703_s28 = smov 0  }
  0x13 LB: > { %s718_s0 = sadd.s32 4294967295, %s653_s28   ;;  %s404_s29 = sadd.s32 4294967294, %s653_s28   ;;  %s653_s28 = sphi %s703_s28, %s960_s28   ;;  %s649_s27 = sphi %s701_s27, %s959_s27   ;;  %s645_s26 = sphi %s699_s26, %s958_s26   ;;  %s641_s25 = sphi %s697_s25, %s957_s25  }
  0x14   : > { %s722_s30 = sadd.s32 1, %s653_s28   ;;  %s34_s5 = sadd.s32 1, %s649_s27 }
  0x15   : > { %s31_s6 = ssub.s32 %s653_s28, %s722_s30  ;;  %p41_p3 = scmp.ne.s32.totalorder %s649_s27, %s645_s26 }
  0x16   : > { %p32_p4 = scmp.eq.s32.totalorder %s31_s6, 0  ;;  %p42_p5 = scmp.eq.s32.totalorder %s653_s28, 0 }
  0x17   : > { %p47_p6 = scmp.ne.s32.totalorder %s645_s26, %s641_s25  ;;  %p48_p7 = scmp.eq.s32.totalorder %s718_s0, 0 }
  0x18   : > { %s734_s7 = scalar_select %p32_p4, %s649_s27, %s34_s5  }
  0x19   : > { %p43_p8 = por %p42_p5, %p41_p3  ;;  %p736_p9 = por %p48_p7, %p47_p6 }
  0x1a   : > { %p123_p10 = scmp.eq.s32.totalorder %s718_s0, 1  ;;  %p129_p11 = scmp.eq.s32.totalorder %s404_s29, 1 }
  0x1b   : > { %s942_s8 = scalar_select %p736_p9, 1, 0 }
  0x1c   : > { %p446_p13 = scmp.lt.s32.totalorder %s653_s28, 2  ;;  %p743_p0 = por %p123_p10, %p41_p3 }
  0x1d   : > { %p747_p1 = por %p129_p11, %p47_p6  ;;  %s149_s11 = sand.u32 1, %s649_s27  }
  0x1e   : > { %s943_s9 = scalar_select %p743_p0, 1, 0 }
  0x1f   : > { %s944_s10 = scalar_select %p747_p1, 1, 0 }
  0x20   : > { %s753_s12 = sshll.u32 %s653_s28, 7  ;;  %s757_s13 = sshll.u32 %s149_s11, 3 }
  0x21   : > { %p759_p2 = pnand %p446_p13, %p43_p8  ;;  %s167_s15 = sand.u32 1, %s653_s28  }
  0x22   : > { %s946_s2 = sld [smem:[#allocation15_spill]]  ;;  %s171_s19 = scalar_lea.vmem [#allocation7], %s757_s13 }
  0x23   : > { %s945_s14 = scalar_select %p759_p2, 1, 0 }
  0x24   : > { %s178_s20 = sshll.u32 %s171_s19, 4  ;;  %s774_s21 = scalar_lea.sflag [#allocation8], %s167_s15  ;;  %s771_s20 = int_to_ptr.vmem [resolvable:$true] %s178_s20 }
  0x25   : > { %p780_p5 = pneg %p759_p2 }
  0x28   : > { %s768_s18 = scalar_lea.hbm %s946_s2, %s753_s12  ;;  %s496_s5 = scalar_lea.hbm %s946_s2, 256 }
  0x29   : > { %s491_s22 = scalar_lea.hbm %s768_s18, 128  ;;  %p497_p8 = scmp.lt.u32.totalorder %s768_s18, %s946_s2 }
  0x2a   : > { %p492_p4 = scmp.ne.s32.totalorder %s768_s18, %s491_s22  ;;  %p498_p10 = scmp.lt.u32.totalorder %s496_s5, %s491_s22 }
  0x2b   : > { %p500_p13 = scmp.lt.u32.totalorder %s491_s22, %s768_s18 }
  0x2c   : > { %p494_p6 = pnand %p780_p5, %p492_p4  ;;  %p499_p11 = por %p498_p10, %p497_p8 }
  0x2e   : > { %p495_p7 = pneg %p494_p6  ;;  %p501_p12 = por %p500_p13, %p499_p11 }
  0x30   : > { %p502_p3 = pnand %p501_p12, %p495_p7 }
  0x32   : > { %505 = shalt.err (!%p502_p3)
}
  0x33   : > { %s506_s15 = scalar_lea.vmem %s771_s20, 128  ;;  %s656_s17 = smov [#allocation7]  }
  0x34   : > { %p507_p4 = scmp.ne.s32.totalorder %s771_s20, %s506_s15  ;;  %s511_s19 = sshll.u32 %s656_s17, 4  ;;  %s512_s19 = int_to_ptr.vmem [resolvable:$false] %s511_s19 }
  0x35   : > { %s513_s24 = scalar_lea.vmem %s512_s19, 256  ;;  %p514_p0 = scmp.lt.s32.totalorder %s771_s20, %s512_s19 }
  0x36   : > { %p509_p6 = pnand %p507_p4, %p780_p5  ;;  %p515_p9 = scmp.lt.s32.totalorder %s513_s24, %s506_s15 }
  0x38   : > { %p510_p1 = pneg %p509_p6  ;;  %p516_p8 = por %p515_p9, %p514_p0 }
  0x3a   : > { %p517_p10 = pnand %p516_p8, %p510_p1 }
  0x3c   : > { %520 = shalt.err (!%p517_p10)
}
  0x3d   : > { %438 = dma.hbm_to_vmem [thread:$0]  (!%p759_p2), %s768_s18, 128, %s771_s20, %s774_s21  }
  0x3e   : > { %p201_p12 = scmp.lt.s32.totalorder %s653_s28, 3  ;;  %s809_s5 = scalar_lea.hbm %s933_s1, %s753_s12 }
  0x3f   : > { %p948_p9 = scmp.ge.s32.totalorder %s653_s28, 1  ;;  %s153_s16 = scalar_lea.vmem [#allocation4], %s757_s13 }
  0x40   : > { %s160_s15 = sshll.u32 %s153_s16, 4  ;;  %s150_s18 = scalar_lea.sflag [#allocation5], %s149_s11  ;;  %s161_s15 = int_to_ptr.vmem [resolvable:$true] %s160_s15 }
  0x41   : > { %p813_p0 = pnand %p948_p9, %p201_p12  ;;  %s521_s20 = scalar_lea.hbm %s809_s5, 128 }
  0x42   : > { %p522_p1 = scmp.ne.s32.totalorder %s809_s5, %s521_s20  ;;  %s526_s24 = scalar_lea.hbm %s933_s1, 256 }
  0x43   : > { %s949_s6 = scalar_select %p813_p0, 1, 0 }
  0x44   : > { %p524_p3 = pnand %p522_p1, %p780_p5  ;;  %p527_p11 = scmp.lt.u32.totalorder %s809_s5, %s933_s1 }
  0x45   : > { %p528_p13 = scmp.lt.u32.totalorder %s526_s24, %s521_s20  ;;  %p530_p6 = scmp.lt.u32.totalorder %s521_s20, %s809_s5 }
  0x46   : > { %p525_p7 = pneg %p524_p3 }
  0x47   : > { %p529_p4 = por %p528_p13, %p527_p11 }
  0x49   : > { %p531_p8 = por %p530_p6, %p529_p4 }
  0x4b   : > { %p532_p10 = pnand %p531_p8, %p525_p7 }
  0x4d   : > { %535 = shalt.err (!%p532_p10)
}
  0x4e   : > { %s536_s11 = scalar_lea.vmem %s161_s15, 128  ;;  %s657_s16 = smov [#allocation4]  }
  0x4f   : > { %p537_p12 = scmp.ne.s32.totalorder %s161_s15, %s536_s11  ;;  %s541_s2 = sshll.u32 %s657_s16, 4  ;;  %s542_s2 = int_to_ptr.vmem [resolvable:$false] %s541_s2 }
  0x50   : > { %s543_s17 = scalar_lea.vmem %s542_s2, 256  ;;  %p544_p3 = scmp.lt.s32.totalorder %s161_s15, %s542_s2 }
  0x51   : > { %p539_p9 = pnand %p537_p12, %p780_p5  ;;  %p545_p0 = scmp.lt.s32.totalorder %s543_s17, %s536_s11 }
  0x53   : > { %p540_p1 = pneg %p539_p9  ;;  %p546_p2 = por %p545_p0, %p544_p3 }
  0x55   : > { %p547_p11 = pnand %p546_p2, %p540_p1 }
  0x57   : > { %550 = shalt.err (!%p547_p11)
}
  0x58   : > { %p950_p13 = scmp.ne.s32.totalorder %s945_s14, 0  ;;  %s841_s24 = scalar_lea.hbm %s935_s3, %s753_s12 }
  0x59   : > { %s189_s2 = scalar_lea.vmem [#allocation9], %s757_s13  ;;  %s551_s29 = scalar_lea.hbm %s841_s24, 128 }
  0x5a   : > { %435 = dma.hbm_to_vmem [thread:$0]  (!%p950_p13), %s809_s5, 128, %s161_s15, %s150_s18  }
  0x5b   : > { %s196_s22 = sshll.u32 %s189_s2, 4  ;;  %p552_p2 = scmp.ne.s32.totalorder %s841_s24, %s551_s29  ;;  %s197_s22 = int_to_ptr.vmem [resolvable:$true] %s196_s22 }
  0x5c   : > { %s556_s5 = scalar_lea.hbm %s935_s3, 256  ;;  %p557_p4 = scmp.lt.u32.totalorder %s841_s24, %s935_s3 }
  0x5d   : > { %p554_p0 = pnand %p552_p2, %p780_p5  ;;  %p558_p6 = scmp.lt.u32.totalorder %s556_s5, %s551_s29 }
  0x5e   : > { %p560_p10 = scmp.lt.u32.totalorder %s551_s29, %s841_s24 }
  0x5f   : > { %p555_p7 = pneg %p554_p0  ;;  %p559_p8 = por %p558_p6, %p557_p4 }
  0x61   : > { %p561_p12 = por %p560_p10, %p559_p8 }
  0x63   : > { %p562_p9 = pnand %p561_p12, %p555_p7 }
  0x65   : > { %565 = shalt.err (!%p562_p9)
}
  0x66   : > { %s566_s12 = scalar_lea.vmem %s197_s22, 128  ;;  %s658_s13 = smov [#allocation9]  }
  0x67   : > { %p567_p1 = scmp.ne.s32.totalorder %s197_s22, %s566_s12  ;;  %s571_s17 = sshll.u32 %s658_s13, 4  ;;  %s572_s17 = int_to_ptr.vmem [resolvable:$false] %s571_s17 }
  0x68   : > { %s573_s20 = scalar_lea.vmem %s572_s17, 256  ;;  %p574_p2 = scmp.lt.s32.totalorder %s197_s22, %s572_s17 }
  0x69   : > { %p569_p3 = pnand %p567_p1, %p780_p5  ;;  %p575_p0 = scmp.lt.s32.totalorder %s573_s20, %s566_s12 }
  0x6b   : > { %p570_p11 = pneg %p569_p3  ;;  %p576_p13 = por %p575_p0, %p574_p2 }
  0x6d   : > { %p577_p4 = pnand %p576_p13, %p570_p11 }
  0x6f   : > { %580 = shalt.err (!%p577_p4)
}
  0x70   : > { %p951_p6 = scmp.ne.s32.totalorder %s945_s14, 0  ;;  %p952_p7 = scmp.ne.s32.totalorder %s949_s6, 0 }
  0x71   : > { %s865_s23 = sand.u32 (!%p952_p7), 1, %s645_s26   ;;  %p953_p5 = scmp.ne.s32.totalorder (!%p952_p7), %s942_s8, 0 }
  0x72   : > { %441 = dma.hbm_to_vmem [thread:$0]  (!%p951_p6), %s841_s24, 128, %s197_s22, %s774_s21  }
  0x73   : > { %205 = sbr.rel (%p952_p7) target bundleno = 154 (0x9a), region = 32  ;;  %s868_s19 = sshll.u32 (!%p952_p7), %s865_s23, 3 }
  0x74   : > { %s208_s2 = scalar_lea.sflag (!%p952_p7), [#allocation5], %s865_s23  ;;  %s211_s29 = scalar_lea.vmem (!%p952_p7), [#allocation4], %s868_s19 }
  0x7a   : > { %628 = dma.done.wait (%p953_p5), %s208_s2, 128  }
  0x7b   : > { %630 = vsyncadd (%p953_p5), %s208_s2, 4294967168  ;;  %s216_s14 = sand.u32 1, %s718_s0   ;;  %s220_s6 = scalar_lea.vmem [#allocation7], %s868_s19 }
  0x7c   : > { %s217_s21 = scalar_lea.sflag [#allocation8], %s216_s14 }
  0x7d   : > { %632 = dma.done.wait (%p953_p5), %s217_s21, 256  }
  0x7e   : > { %634 = vsyncadd (%p953_p5), %s217_s21, 4294967040  ;;  %s263_s24 = sld [smem:[#allocation3]]  ;;  %s418_s22 = sld [smem:[#allocation3 + $0x1]]  ;;  %v262_v0 = vld [vmem:[%s211_s29] sm:$0xff]  ;;  %v266_v2 = vld [vmem:[%s220_s6] sm:$0xff] }
  0x7f   : > { %s419_s11 = sld [smem:[#allocation3 + $0x2]]  ;;  %s229_s16 = scalar_lea.vmem [#allocation9], %s868_s19 }
  0x80   : > { %v271_v6 = vld [vmem:[%s229_s16] sm:$0xff]  ;;  %s261_s5 = scalar_lea.vmem [#allocation10], %s868_s19  ;;  %s421_s15 = sshll.u32 %s718_s0, 7 }
  0x81   : > { %s291_s8 = sshll.u32 %s261_s5, 4  ;;  %s890_s13 = scalar_lea.hbm %s936_s4, %s421_s15  ;;  %s885_s8 = int_to_ptr.vmem [resolvable:$true] %s291_s8 }
  0x82   : > { %s278_s17 = scalar_lea.sflag [#allocation6], %s865_s23  ;;  %s581_s20 = scalar_lea.vmem %s885_s8, 128 }
  0x83   : > { %p582_p13 = scmp.ne.s32.totalorder %s885_s8, %s581_s20  ;;  %p954_p8 = scmp.ne.s32.totalorder %s943_s9, 0 }
  0x84   : > { %v264_v1 = vstv %s263_s24  ;;  %v268_v3 = vstv %s418_s22  ;;  %s659_s0 = smov [#allocation10]  }
  0x85   : > { %v265_v4 = vmul.f32 %v264_v1, %v262_v0  ;;  %v269_v5 = vmul.f32 %v268_v3, %v266_v2  ;;  %v273_v7 = vstv %s419_s11  ;;  %p583_p10 = pnand %p582_p13, %p954_p8  ;;  %s585_s19 = sshll.u32 %s659_s0, 4  ;;  %s586_s19 = int_to_ptr.vmem [resolvable:$false] %s585_s19 }
  0x86   : > { %v274_v8 = vmul.f32 %v273_v7, %v271_v6  ;;  %s587_s2 = scalar_lea.vmem %s586_s19, 256  ;;  %p588_p9 = scmp.lt.s32.totalorder %s885_s8, %s586_s19 }
  0x87   : > { %v270_v9 = vadd.f32 %v269_v5, %v265_v4  ;;  %p584_p12 = pneg %p583_p10  ;;  %p589_p1 = scmp.lt.s32.totalorder %s587_s2, %s581_s20 }
  0x89   : > { %v275_v10 = vadd.f32 %v274_v8, %v270_v9  ;;  %p590_p3 = por %p589_p1, %p588_p9 }
  0x8b   : > { %276 = vst [vmem:[%s261_s5] sm:$0xff] %v275_v10  ;;  %p591_p11 = pnand %p590_p3, %p584_p12 }
  0x8d   : > { %594 = shalt.err (!%p591_p11)
}
  0x8e   : > { %s595_s23 = scalar_lea.hbm %s890_s13, 128  ;;  %s599_s21 = scalar_lea.hbm %s936_s4, 256 }
  0x8f   : > { %p596_p2 = scmp.ne.s32.totalorder %s890_s13, %s595_s23  ;;  %p600_p6 = scmp.lt.u32.totalorder %s890_s13, %s936_s4 }
  0x90   : > { %p601_p7 = scmp.lt.u32.totalorder %s599_s21, %s595_s23  ;;  %p603_p13 = scmp.lt.u32.totalorder %s595_s23, %s890_s13 }
  0x91   : > { %p597_p0 = pnand %p596_p2, %p954_p8 }
  0x92   : > { %p602_p5 = por %p601_p7, %p600_p6 }
  0x93   : > { %p598_p4 = pneg %p597_p0 }
  0x94   : > { %p604_p10 = por %p603_p13, %p602_p5 }
  0x96   : > { %p605_p12 = pnand %p604_p10, %p598_p4 }
  0x98   : > { %608 = shalt.err (!%p605_p12)
}
  0x99   : > { %430 = dma.vmem_to_hbm [thread:$0]  (%p954_p8), %s885_s8, 128, %s890_s13, %s278_s17  }
  0x9a PF: > { %s303_s22 = sand.u32 1, %s641_s25   ;;  %p955_p9 = scmp.ne.s32.totalorder %s944_s10, 0 }
  0x9b   : > { %p956_p1 = scmp.ge.s32.totalorder %s653_s28, 2  ;;  %s304_s11 = scalar_lea.sflag [#allocation6], %s303_s22 }
  0x9d   : > { %p443_p3 = pnand %p956_p1, %p955_p9 }
  0x9f   : > { %636 = dma.done.wait (!%p443_p3), %s304_s11, 128  }
  0xa0   : > { %638 = vsyncadd (!%p443_p3), %s304_s11, 4294967168  ;;  %p24_p11 = scmp.ge.s32.totalorder %s722_s30, 4   ;;  %s957_s25 = smov %s645_s26 }
  0xa1   : > { %s958_s26 = smov %s649_s27  ;;  %s959_s27 = smov %s734_s7 }
  0xa2   : > { %s960_s28 = smov %s722_s30  ;;  %26 = sbr.rel (!%p24_p11) target bundleno = 19 (0x13), region = 101 }
  0xa9   :  { %309 = vsyncpa [#allocation5], 1 }
  0xaa   :  { %311 = vsyncpa [#allocation5 + $0x1], 1 }
  0xab   :  { %312 = vsyncpa [#allocation8], 1 }
  0xac   :  { %314 = vsyncpa [#allocation8 + $0x1], 1 }
  0xad   :  { %315 = vsyncpa [#allocation6], 1 }
  0xae   :  { %317 = vsyncpa [#allocation6 + $0x1], 1 }

</bundles_post_ra>
